<compile_context>
chip_gen: v7x
topology: tpu7x:2x2x1
jax: 0.10.0
libtpu: 0.0.40
codegen_flags: <defaults>
</compile_context>

<pallas_src>
import functools
import math

import numpy as np

import jax
import jax.numpy as jnp
from jax.experimental import pallas as pl
from jax.experimental.pallas import tpu as pltpu


# ----------------------------- Pallas kernels ------------------------------ #
def _fourier_scalar_kernel(n, rng_ref, bias_ref, sp_ref, cp_ref, x_ref, o_ref):
    """n_var == 1 path: per-harmonic coefficients are scalars in SMEM.

    out = sum_{k=1..n} sp[k-1]*sin(k*theta) + cp[k-1]*cos(k*theta) + bias,
    theta = x*w1.  Evaluated with Clenshaw's backward recurrence so only one
    sin and one cos are needed per element.
    """
    theta = x_ref[...] * rng_ref[0]                       # (TR, C) f32
    s = jnp.sin(theta)
    c = jnp.cos(theta)
    t = 2.0 * c
    # Clenshaw: u_j = a_j + t*u_{j+1} - u_{j+2},  u_{n+1} = u_{n+2} = 0.
    z1 = jnp.full_like(theta, sp_ref[n - 1])              # u_n for sin series
    z2 = jnp.zeros_like(theta)
    y1 = jnp.full_like(theta, cp_ref[n - 1])              # u_n for cos series
    y2 = jnp.zeros_like(theta)
    for k in range(n - 2, -1, -1):                        # static, unrolled VPU loop
        z1, z2 = sp_ref[k] + t * z1 - z2, z1
        y1, y2 = cp_ref[k] + t * y1 - y2, y1
    # sum_k a_k sin(k*theta) = s*z1 ;  sum_k b_k cos(k*theta) = c*y1 - y2
    o_ref[...] = s * z1 + c * y1 - y2 + bias_ref[0]


def _fourier_rows_kernel(n, rng_ref, bias_ref, sp_ref, cp_ref, x_ref, o_ref):
    """n_var > 1 path: coefficients are lane-patterned (n, C) rows in VMEM.

    Column col of the x block holds variable (col % n_var); sp_ref[k]/cp_ref[k]
    are the matching per-lane coefficient rows, broadcast over sublanes.
    """
    theta = x_ref[...] * rng_ref[0]                       # (TR, C) f32
    s = jnp.sin(theta)
    c = jnp.cos(theta)
    t = 2.0 * c
    z1 = jnp.broadcast_to(sp_ref[n - 1:n, :], theta.shape)
    z2 = jnp.zeros_like(theta)
    y1 = jnp.broadcast_to(cp_ref[n - 1:n, :], theta.shape)
    y2 = jnp.zeros_like(theta)
    for k in range(n - 2, -1, -1):
        z1, z2 = sp_ref[k:k + 1, :] + t * z1 - z2, z1
        y1, y2 = cp_ref[k:k + 1, :] + t * y1 - y2, y1
    o_ref[...] = s * z1 + c * y1 - y2 + bias_ref[0]


# --------------------------- tiling / launch helpers ------------------------ #
_SMEM_SPEC = pl.BlockSpec(memory_space=pltpu.MemorySpace.SMEM)


def _block_elem_budget(n):
    # ~2 MiB f32 blocks when the kernel is HBM-bound (few harmonics, helps v5e),
    # ~1 MiB when it is VALU-bound (n >= 5).  Total VMEM stays well below the
    # explicit 48 MiB limit (and v7x's 64 MiB physical).
    return (1 << 19) if n <= 4 else (1 << 18)


def _pick_rows_per_block(R, C, n):
    """Rows per block: multiple of 8 (or the full R), and capped so the
    'parallel' grid axis has >= 2 steps whenever R >= 16 (v7x megacore)."""
    max_tr = max(8, (_block_elem_budget(n) // C) // 8 * 8)
    if R <= max_tr:
        if R >= 16:
            half = -(-R // 2)
            return min(max_tr, ((half + 7) // 8) * 8)
        return R
    return max_tr


def _launch(kernel, x2d, args_before_x, specs_before_x, n):
    R, C = int(x2d.shape[0]), int(x2d.shape[1])
    TR = _pick_rows_per_block(R, C, n)
    return pl.pallas_call(
        kernel,
        out_shape=jax.ShapeDtypeStruct((R, C), jnp.float32),
        grid=(pl.cdiv(R, TR),),
        in_specs=list(specs_before_x) + [pl.BlockSpec((TR, C), lambda r: (r, 0))],
        out_specs=pl.BlockSpec((TR, C), lambda r: (r, 0)),
        compiler_params=pltpu.CompilerParams(
            dimension_semantics=("parallel",),
            vmem_limit_bytes=48 * 1024 * 1024),
    )(*args_before_x, x2d)


# ------------------------------ n_var == 1 path ----------------------------- #
def _jax_fourier_scalar(x_flat, rng, bias, sp, cp):
    xr = x_flat[:, None] * rng[None, :]
    return (jnp.sin(xr) * sp).sum(-1) + (jnp.cos(xr) * cp).sum(-1) + bias[0]


def _choose_cols(Mp):
    for c in (1024, 512, 256, 128):
        if Mp % c == 0 and Mp // c >= 8:
            return c
    for c in (1024, 512, 256, 128):
        if Mp % c == 0:
            return c
    return 128


def _fourier_elementwise(x_flat, rng, bias, sp, cp, n):
    """n_var == 1: pure elementwise on a flat (M,) f32 array -> (M,) f32."""
    M = int(x_flat.shape[0])
    Mp = (M // 128) * 128                       # kernel handles the 128-divisible prefix
    if Mp == 0:
        return _jax_fourier_scalar(x_flat, rng, bias, sp, cp)
    C = _choose_cols(Mp)
    R = Mp // C
    x2d = (x_flat if Mp == M else x_flat[:Mp]).reshape(R, C)   # free when Mp == M
    kernel = functools.partial(_fourier_scalar_kernel, n)
    out = _launch(kernel, x2d,
                  (rng, bias, sp, cp),
                  (_SMEM_SPEC, _SMEM_SPEC, _SMEM_SPEC, _SMEM_SPEC),
                  n).reshape(-1)
    if Mp < M:
        # <=127-element tail in plain JAX (no pad/slice of the whole array).
        tail = _jax_fourier_scalar(x_flat[Mp:], rng, bias, sp, cp)
        out = jnp.concatenate([out, tail])
    return out


# ------------------------------ n_var > 1 path ------------------------------ #
def _jax_fourier_multivar_flat(x_flat, rng, bias, sp2d, cp2d, V):
    # flat index j -> variable j % V (caller guarantees start offset % V == 0)
    T = int(x_flat.shape[0])
    v_idx = jnp.arange(T, dtype=jnp.int32) % V
    xr = x_flat[:, None] * rng[None, :]
    return ((jnp.sin(xr) * sp2d[v_idx]).sum(-1)
            + (jnp.cos(xr) * cp2d[v_idx]).sum(-1) + bias[0])


def _choose_cols_multivar(M, L):
    cands = sorted({L * m for m in (32, 16, 8, 4, 2, 1) if L * m <= 4096},
                   reverse=True)
    for c in cands:
        if M % c == 0 and M // c >= 8:
            return c
    for c in cands:
        if M % c == 0:
            return c
    return cands[-1]                            # smallest -> smallest plain-JAX tail


def _fourier_multivar(x2d_in, rng, bias, sp2d, cp2d, n, V):
    """n_var > 1 batched: x (B, V) f32 -> (B, V) f32, no transposes."""
    B = int(x2d_in.shape[0])
    M = B * V
    x_flat = x2d_in.reshape(-1)                 # row-major: flat j -> variable j % V
    L = (128 * V) // math.gcd(128, V)           # lane period of the variable pattern
    if L > 4096:
        # TODO(synk): n_var with lcm(128, n_var) > 4096 has no compact
        # lane-patterned coefficient layout; rare case kept in plain JAX.
        return _jax_fourier_multivar_flat(x_flat, rng, bias, sp2d, cp2d,
                                          V).reshape(B, V)
    C = _choose_cols_multivar(M, L)
    Mp = (M // C) * C
    if Mp == 0:                                 # tiny input: plain JAX
        return _jax_fourier_multivar_flat(x_flat, rng, bias, sp2d, cp2d,
                                          V).reshape(B, V)
    R = Mp // C
    # lane-patterned coefficient rows (built once, tiny): rows[k, col] = coeff[col % V, k]
    sp_rows = jnp.tile(sp2d.T, (1, C // V))     # (n, C)
    cp_rows = jnp.tile(cp2d.T, (1, C // V))     # (n, C)
    x2d = (x_flat if Mp == M else x_flat[:Mp]).reshape(R, C)
    kernel = functools.partial(_fourier_rows_kernel, n)
    coeff_spec = pl.BlockSpec((n, C), lambda r: (0, 0))      # resident slab
    out = _launch(kernel, x2d,
                  (rng, bias, sp_rows, cp_rows),
                  (_SMEM_SPEC, _SMEM_SPEC, coeff_spec, coeff_spec),
                  n).reshape(-1)
    if Mp < M:
        tail = _jax_fourier_multivar_flat(x_flat[Mp:], rng, bias, sp2d, cp2d, V)
        out = jnp.concatenate([out, tail])
    return out.reshape(B, V)


# ------------------------- Module-equivalent wrapper ------------------------ #
class FourierSeries:
    """JAX/Pallas port of the PyTorch FourierSeries module (forward pass)."""

    def __init__(self, n_var: int = 1, n: int = 10, period: float = 2.0, key=None):
        if key is None:
            key = jax.random.PRNGKey(0)
        cst = 2.0 * jnp.pi / period
        self.n_var = n_var
        self.n = n
        self.range = jnp.arange(1, n + 1, dtype=jnp.float32) * cst          # (n,)
        k1, k2, k3 = jax.random.split(key, 3)
        self.sin_params = jax.random.normal(k1, (n * n_var,), dtype=jnp.float32)
        self.cos_params = jax.random.normal(k2, (n * n_var,), dtype=jnp.float32)
        self.bias = jax.random.normal(k3, (1,), dtype=jnp.float32)

    def __call__(self, x):
        n, V = self.n, self.n_var
        x = jnp.asarray(x, dtype=jnp.float32)
        if V == 1:
            orig_shape = x.shape
            out = _fourier_elementwise(x.reshape(-1), self.range, self.bias,
                                       self.sin_params, self.cos_params, n)
            return out.reshape(orig_shape)
        elif x.ndim == 1:
            # TODO(synk): n_var>1 with 1-D input collapses to a single scalar
            # reduction; kept in plain JAX (not worth a Pallas kernel).
            xr = (x[:, None] * self.range).reshape(-1)
            return ((jnp.sin(xr) * self.sin_params).sum()
                    + (jnp.cos(xr) * self.cos_params).sum() + self.bias)
        else:
            # batched multi-variable case: x is (B, n_var) -> output (B, n_var)
            return _fourier_multivar(x, self.range, self.bias,
                                     self.sin_params.reshape(V, n),
                                     self.cos_params.reshape(V, n), n, V)


# ----------------------------- pure-JAX reference --------------------------- #
def _reference(x, mod: FourierSeries):
    x = x.astype(jnp.float32)
    if mod.n_var == 1:
        xr = x[..., None] * mod.range
        return ((jnp.sin(xr) * mod.sin_params).sum(-1)
                + (jnp.cos(xr) * mod.cos_params).sum(-1) + mod.bias)
    else:
        B = x.shape[0]
        xr = (x[..., None] * mod.range).reshape(B, -1)
        return ((jnp.sin(xr) * mod.sin_params).reshape(B, mod.n_var, -1).sum(-1)
                + (jnp.cos(xr) * mod.cos_params).reshape(B, mod.n_var, -1).sum(-1)
                + mod.bias)


if __name__ == "__main__":
    key = jax.random.PRNGKey(0)
    kp1, kp2, kx1, kx2, kx3 = jax.random.split(key, 5)

    # Case 1: default n_var=1, arbitrary-shape (NCHW-like) input.
    fs1 = FourierSeries(n_var=1, n=10, period=2.0, key=kp1)
    x1 = jax.random.normal(kx1, (2, 4, 16, 16), dtype=jnp.float32)
    y1 = jax.block_until_ready(fs1(x1))
    assert y1.shape == x1.shape

    # Case 2: n_var=1, length not divisible by 128 (prefix-kernel + JAX tail).
    x3 = jax.random.normal(kx3, (2100,), dtype=jnp.float32)
    y3 = jax.block_until_ready(fs1(x3))
    assert y3.shape == (2100,)

    # Case 3: n_var=4, batched (B, n_var) input (lane-patterned rows kernel).
    fs2 = FourierSeries(n_var=4, n=10, period=2.0, key=kp2)
    x2 = jax.random.normal(kx2, (256, 4), dtype=jnp.float32)
    y2 = jax.block_until_ready(fs2(x2))
    assert y2.shape == (256, 4)

    # Sanity checks against a pure-JAX reference of the PyTorch forward.
    np.testing.assert_allclose(np.asarray(y1), np.asarray(_reference(x1, fs1)),
                               rtol=2e-3, atol=2e-3)
    np.testing.assert_allclose(np.asarray(y3), np.asarray(_reference(x3, fs1)),
                               rtol=2e-3, atol=2e-3)
    np.testing.assert_allclose(np.asarray(y2), np.asarray(_reference(x2, fs2)),
                               rtol=2e-3, atol=2e-3)

    print("KERNEL_OK")
</pallas_src>

<mosaic_0001>
module attributes {stable_mosaic.version = 11 : i64} {
  func.func @_fourier_scalar_kernel(%arg0: i32, %arg1: memref<10xf32, #tpu.memory_space<smem>>, %arg2: memref<1xf32, #tpu.memory_space<smem>>, %arg3: memref<10xf32, #tpu.memory_space<smem>>, %arg4: memref<10xf32, #tpu.memory_space<smem>>, %arg5: memref<8x256xf32, #tpu.memory_space<vmem>>, %arg6: memref<8x256xf32, #tpu.memory_space<vmem>>) attributes {dimension_semantics = [#tpu.dimension_semantics<parallel>], iteration_bounds = array<i64: 1>, scalar_prefetch = 0 : i64, scratch_operands = 0 : i64, tpu.core_type = #tpu.core_type<tc>, window_params = [{transform_indices = @transform_0, window_bounds = array<i64: 10>}, {transform_indices = @transform_1, window_bounds = array<i64: 1>}, {transform_indices = @transform_2, window_bounds = array<i64: 10>}, {transform_indices = @transform_3, window_bounds = array<i64: 10>}, {transform_indices = @transform_4, window_bounds = array<i64: 8, 256>}, {transform_indices = @transform_5, window_bounds = array<i64: 8, 256>}]} {
    %c0 = arith.constant 0 : index
    %c0_0 = arith.constant 0 : index
    %0 = vector.load %arg5[%c0, %c0_0] : memref<8x256xf32, #tpu.memory_space<vmem>>, vector<8x256xf32>
    %c0_1 = arith.constant 0 : index
    %1 = memref.load %arg1[%c0_1] : memref<10xf32, #tpu.memory_space<smem>>
    %2 = vector.broadcast %1 : f32 to vector<8x256xf32>
    %3 = arith.mulf %0, %2 : vector<8x256xf32>
    %4 = math.sin %3 : vector<8x256xf32>
    %5 = math.cos %3 : vector<8x256xf32>
    %cst = arith.constant 2.000000e+00 : f32
    %6 = vector.broadcast %cst : f32 to vector<8x256xf32>
    %7 = arith.mulf %6, %5 : vector<8x256xf32>
    %c9 = arith.constant 9 : index
    %8 = memref.load %arg3[%c9] : memref<10xf32, #tpu.memory_space<smem>>
    %9 = vector.broadcast %8 : f32 to vector<8x256xf32>
    %cst_2 = arith.constant 0.000000e+00 : f32
    %10 = vector.broadcast %cst_2 : f32 to vector<8x256xf32>
    %c9_3 = arith.constant 9 : index
    %11 = memref.load %arg4[%c9_3] : memref<10xf32, #tpu.memory_space<smem>>
    %12 = vector.broadcast %11 : f32 to vector<8x256xf32>
    %cst_4 = arith.constant 0.000000e+00 : f32
    %13 = vector.broadcast %cst_4 : f32 to vector<8x256xf32>
    %c8 = arith.constant 8 : index
    %14 = memref.load %arg3[%c8] : memref<10xf32, #tpu.memory_space<smem>>
    %15 = arith.mulf %7, %9 : vector<8x256xf32>
    %16 = vector.broadcast %14 : f32 to vector<8x256xf32>
    %17 = arith.addf %16, %15 : vector<8x256xf32>
    %18 = arith.subf %17, %10 : vector<8x256xf32>
    %c8_5 = arith.constant 8 : index
    %19 = memref.load %arg4[%c8_5] : memref<10xf32, #tpu.memory_space<smem>>
    %20 = arith.mulf %7, %12 : vector<8x256xf32>
    %21 = vector.broadcast %19 : f32 to vector<8x256xf32>
    %22 = arith.addf %21, %20 : vector<8x256xf32>
    %23 = arith.subf %22, %13 : vector<8x256xf32>
    %c7 = arith.constant 7 : index
    %24 = memref.load %arg3[%c7] : memref<10xf32, #tpu.memory_space<smem>>
    %25 = arith.mulf %7, %18 : vector<8x256xf32>
    %26 = vector.broadcast %24 : f32 to vector<8x256xf32>
    %27 = arith.addf %26, %25 : vector<8x256xf32>
    %28 = arith.subf %27, %9 : vector<8x256xf32>
    %c7_6 = arith.constant 7 : index
    %29 = memref.load %arg4[%c7_6] : memref<10xf32, #tpu.memory_space<smem>>
    %30 = arith.mulf %7, %23 : vector<8x256xf32>
    %31 = vector.broadcast %29 : f32 to vector<8x256xf32>
    %32 = arith.addf %31, %30 : vector<8x256xf32>
    %33 = arith.subf %32, %12 : vector<8x256xf32>
    %c6 = arith.constant 6 : index
    %34 = memref.load %arg3[%c6] : memref<10xf32, #tpu.memory_space<smem>>
    %35 = arith.mulf %7, %28 : vector<8x256xf32>
    %36 = vector.broadcast %34 : f32 to vector<8x256xf32>
    %37 = arith.addf %36, %35 : vector<8x256xf32>
    %38 = arith.subf %37, %18 : vector<8x256xf32>
    %c6_7 = arith.constant 6 : index
    %39 = memref.load %arg4[%c6_7] : memref<10xf32, #tpu.memory_space<smem>>
    %40 = arith.mulf %7, %33 : vector<8x256xf32>
    %41 = vector.broadcast %39 : f32 to vector<8x256xf32>
    %42 = arith.addf %41, %40 : vector<8x256xf32>
    %43 = arith.subf %42, %23 : vector<8x256xf32>
    %c5 = arith.constant 5 : index
    %44 = memref.load %arg3[%c5] : memref<10xf32, #tpu.memory_space<smem>>
    %45 = arith.mulf %7, %38 : vector<8x256xf32>
    %46 = vector.broadcast %44 : f32 to vector<8x256xf32>
    %47 = arith.addf %46, %45 : vector<8x256xf32>
    %48 = arith.subf %47, %28 : vector<8x256xf32>
    %c5_8 = arith.constant 5 : index
    %49 = memref.load %arg4[%c5_8] : memref<10xf32, #tpu.memory_space<smem>>
    %50 = arith.mulf %7, %43 : vector<8x256xf32>
    %51 = vector.broadcast %49 : f32 to vector<8x256xf32>
    %52 = arith.addf %51, %50 : vector<8x256xf32>
    %53 = arith.subf %52, %33 : vector<8x256xf32>
    %c4 = arith.constant 4 : index
    %54 = memref.load %arg3[%c4] : memref<10xf32, #tpu.memory_space<smem>>
    %55 = arith.mulf %7, %48 : vector<8x256xf32>
    %56 = vector.broadcast %54 : f32 to vector<8x256xf32>
    %57 = arith.addf %56, %55 : vector<8x256xf32>
    %58 = arith.subf %57, %38 : vector<8x256xf32>
    %c4_9 = arith.constant 4 : index
    %59 = memref.load %arg4[%c4_9] : memref<10xf32, #tpu.memory_space<smem>>
    %60 = arith.mulf %7, %53 : vector<8x256xf32>
    %61 = vector.broadcast %59 : f32 to vector<8x256xf32>
    %62 = arith.addf %61, %60 : vector<8x256xf32>
    %63 = arith.subf %62, %43 : vector<8x256xf32>
    %c3 = arith.constant 3 : index
    %64 = memref.load %arg3[%c3] : memref<10xf32, #tpu.memory_space<smem>>
    %65 = arith.mulf %7, %58 : vector<8x256xf32>
    %66 = vector.broadcast %64 : f32 to vector<8x256xf32>
    %67 = arith.addf %66, %65 : vector<8x256xf32>
    %68 = arith.subf %67, %48 : vector<8x256xf32>
    %c3_10 = arith.constant 3 : index
    %69 = memref.load %arg4[%c3_10] : memref<10xf32, #tpu.memory_space<smem>>
    %70 = arith.mulf %7, %63 : vector<8x256xf32>
    %71 = vector.broadcast %69 : f32 to vector<8x256xf32>
    %72 = arith.addf %71, %70 : vector<8x256xf32>
    %73 = arith.subf %72, %53 : vector<8x256xf32>
    %c2 = arith.constant 2 : index
    %74 = memref.load %arg3[%c2] : memref<10xf32, #tpu.memory_space<smem>>
    %75 = arith.mulf %7, %68 : vector<8x256xf32>
    %76 = vector.broadcast %74 : f32 to vector<8x256xf32>
    %77 = arith.addf %76, %75 : vector<8x256xf32>
    %78 = arith.subf %77, %58 : vector<8x256xf32>
    %c2_11 = arith.constant 2 : index
    %79 = memref.load %arg4[%c2_11] : memref<10xf32, #tpu.memory_space<smem>>
    %80 = arith.mulf %7, %73 : vector<8x256xf32>
    %81 = vector.broadcast %79 : f32 to vector<8x256xf32>
    %82 = arith.addf %81, %80 : vector<8x256xf32>
    %83 = arith.subf %82, %63 : vector<8x256xf32>
    %c1 = arith.constant 1 : index
    %84 = memref.load %arg3[%c1] : memref<10xf32, #tpu.memory_space<smem>>
    %85 = arith.mulf %7, %78 : vector<8x256xf32>
    %86 = vector.broadcast %84 : f32 to vector<8x256xf32>
    %87 = arith.addf %86, %85 : vector<8x256xf32>
    %88 = arith.subf %87, %68 : vector<8x256xf32>
    %c1_12 = arith.constant 1 : index
    %89 = memref.load %arg4[%c1_12] : memref<10xf32, #tpu.memory_space<smem>>
    %90 = arith.mulf %7, %83 : vector<8x256xf32>
    %91 = vector.broadcast %89 : f32 to vector<8x256xf32>
    %92 = arith.addf %91, %90 : vector<8x256xf32>
    %93 = arith.subf %92, %73 : vector<8x256xf32>
    %c0_13 = arith.constant 0 : index
    %94 = memref.load %arg3[%c0_13] : memref<10xf32, #tpu.memory_space<smem>>
    %95 = arith.mulf %7, %88 : vector<8x256xf32>
    %96 = vector.broadcast %94 : f32 to vector<8x256xf32>
    %97 = arith.addf %96, %95 : vector<8x256xf32>
    %98 = arith.subf %97, %78 : vector<8x256xf32>
    %c0_14 = arith.constant 0 : index
    %99 = memref.load %arg4[%c0_14] : memref<10xf32, #tpu.memory_space<smem>>
    %100 = arith.mulf %7, %93 : vector<8x256xf32>
    %101 = vector.broadcast %99 : f32 to vector<8x256xf32>
    %102 = arith.addf %101, %100 : vector<8x256xf32>
    %103 = arith.subf %102, %83 : vector<8x256xf32>
    %104 = arith.mulf %4, %98 : vector<8x256xf32>
    %105 = arith.mulf %5, %103 : vector<8x256xf32>
    %106 = arith.addf %104, %105 : vector<8x256xf32>
    %107 = arith.subf %106, %93 : vector<8x256xf32>
    %c0_15 = arith.constant 0 : index
    %108 = memref.load %arg2[%c0_15] : memref<1xf32, #tpu.memory_space<smem>>
    %109 = vector.broadcast %108 : f32 to vector<8x256xf32>
    %110 = arith.addf %107, %109 : vector<8x256xf32>
    %c0_16 = arith.constant 0 : index
    %c0_17 = arith.constant 0 : index
    %111 = vector.load %arg6[%c0_16, %c0_17] : memref<8x256xf32, #tpu.memory_space<vmem>>, vector<8x256xf32>
    tpu.vector_store %arg6[%c0_16, %c0_17], %110 {strides = array<i32>} : memref<8x256xf32, #tpu.memory_space<vmem>>, vector<8x256xf32>,
    return
  }
  func.func @transform_0(%arg0: i32) -> i32 {
    %c0_i32 = arith.constant 0 : i32
    %c0_i32_0 = arith.constant 0 : i32
    return %c0_i32 : i32
  }
  func.func @transform_1(%arg0: i32) -> i32 {
    %c0_i32 = arith.constant 0 : i32
    %c0_i32_0 = arith.constant 0 : i32
    return %c0_i32 : i32
  }
  func.func @transform_2(%arg0: i32) -> i32 {
    %c0_i32 = arith.constant 0 : i32
    %c0_i32_0 = arith.constant 0 : i32
    return %c0_i32 : i32
  }
  func.func @transform_3(%arg0: i32) -> i32 {
    %c0_i32 = arith.constant 0 : i32
    %c0_i32_0 = arith.constant 0 : i32
    return %c0_i32 : i32
  }
  func.func @transform_4(%arg0: i32) -> (i32, i32) {
    %c0_i32 = arith.constant 0 : i32
    %c0_i32_0 = arith.constant 0 : i32
    return %arg0, %c0_i32 : i32, i32
  }
  func.func @transform_5(%arg0: i32) -> (i32, i32) {
    %c0_i32 = arith.constant 0 : i32
    %c0_i32_0 = arith.constant 0 : i32
    return %arg0, %c0_i32 : i32, i32
  }
}

</mosaic_0001>

<bundles_post_ra>
// kernel: tpu_custom_call.1
= control target key start
LH: loop header
LB: loop body
LE: loop exit
PB: predicated region body
PF: predicated region fallthrough
CT: control target
= control target key end

     0   :  { %11 = vsyncpa [#allocation6], 0  ;;  %s1082_s0 = inlined_call_operand.vmem [shape: f32[10], index: 0, kind: input, shape index: {}]   ;;  %s1083_s1 = inlined_call_operand.<no memory space> [shape: f32[1], index: 1, kind: input, shape index: {}]   ;;  %s1084_s2 = inlined_call_operand.vmem [shape: f32[10], index: 2, kind: input, shape index: {}]   ;;  %s1085_s3 = inlined_call_operand.vmem [shape: f32[10], index: 3, kind: input, shape index: {}]   ;;  %s1086_s4 = inlined_call_operand.hbm [shape: f32[8,256], index: 4, kind: input, shape index: {}]   ;;  %s1087_s5 = inlined_call_operand.hbm [shape: f32[8,256], index: 5, kind: output, shape index: {}]  }
   0x1   :  { %12 = vsyncpa [#allocation8], 0 }
   0x2   :  { %13 = vsyncpa [#allocation4], 0  ;;  %s33_s20 = sshll.u32 %s1084_s2, 4  ;;  %s34_s20 = int_to_ptr.vmem [resolvable:$true] %s33_s20 }
   0x3   :  { %14 = vsyncpa [#allocation5], 0  ;;  %s21_s23 = sshll.u32 %s1082_s0, 4  ;;  %s728_s24 = scalar_lea.vmem %s34_s20, 16  ;;  %s22_s23 = int_to_ptr.vmem [resolvable:$true] %s21_s23 }
   0x4   :  { %p729_p0 = scmp.ne.s32.totalorder %s34_s20, %s728_s24  ;;  %p733_p1 = scmp.lt.s32.totalorder %s34_s20, %s34_s20 }
   0x5   :  { %p734_p2 = scmp.lt.s32.totalorder %s728_s24, %s728_s24 }
   0x7   :  { %p735_p3 = por %p734_p2, %p733_p1 }
   0x9   :  { %p736_p4 = pnand %p735_p3, %p729_p0 }
   0xb   :  { %739 = shalt.err (!%p736_p4)
}
   0xc   :  { %s816_s25 = smov [#allocation7]   ;;  %s740_s26 = scalar_lea.vmem %s22_s23, 16 }
   0xd   :  { %36 = dma.vmem_to_smem %s34_s20, 16, %s816_s25, [#allocation8]  }
   0xe   :  { %p741_p5 = scmp.ne.s32.totalorder %s22_s23, %s740_s26  ;;  %p745_p6 = scmp.lt.s32.totalorder %s22_s23, %s22_s23 }
   0xf   :  { %p746_p7 = scmp.lt.s32.totalorder %s740_s26, %s740_s26 }
  0x11   :  { %p747_p8 = por %p746_p7, %p745_p6 }
  0x13   :  { %p748_p9 = pnand %p747_p8, %p741_p5 }
  0x15   :  { %751 = shalt.err (!%p748_p9)
}
  0x16   :  { %s817_s2 = smov [#allocation3]   ;;  %s43_s28 = sshll.u32 %s1085_s3, 4  ;;  %s44_s28 = int_to_ptr.vmem [resolvable:$true] %s43_s28 }
  0x17   :  { %24 = dma.vmem_to_smem %s22_s23, 16, %s817_s2, [#allocation6]  }
  0x18   :  { %s752_s29 = scalar_lea.vmem %s44_s28, 16  ;;  %p757_p11 = scmp.lt.s32.totalorder %s44_s28, %s44_s28 }
  0x19   :  { %p753_p10 = scmp.ne.s32.totalorder %s44_s28, %s752_s29  ;;  %p758_p12 = scmp.lt.s32.totalorder %s752_s29, %s752_s29 }
  0x1b   :  { %p759_p13 = por %p758_p12, %p757_p11 }
  0x1d   :  { %p760_p0 = pnand %p759_p13, %p753_p10 }
  0x1f   :  { %763 = shalt.err (!%p760_p0)
}
  0x20   :  { %s818_s30 = smov [#allocation9]   ;;  %s819_s6 = smov [#allocation10]  }
  0x21   :  { %46 = dma.vmem_to_smem %s44_s28, 16, %s818_s30, [#allocation8]  }
  0x22   :  { %s53_s7 = sshll.u32 %s819_s6, 4  ;;  %s764_s10 = scalar_lea.hbm %s1086_s4, 256  ;;  %s54_s7 = int_to_ptr.vmem [resolvable:$true] %s53_s7 }
  0x23   :  { %p765_p1 = scmp.ne.s32.totalorder %s1086_s4, %s764_s10  ;;  %p768_p2 = scmp.lt.u32.totalorder %s764_s10, %s1086_s4 }
  0x25   :  { %p770_p3 = pnand %p768_p2, %p765_p1 }
  0x27   :  { %773 = shalt.err (!%p770_p3)
}
  0x28   :  { %s774_s14 = scalar_lea.vmem %s54_s7, 256  ;;  %p779_p5 = scmp.lt.s32.totalorder %s54_s7, %s54_s7 }
  0x29   :  { %p775_p4 = scmp.ne.s32.totalorder %s54_s7, %s774_s14  ;;  %p780_p6 = scmp.lt.s32.totalorder %s774_s14, %s774_s14 }
  0x2b   :  { %p781_p7 = por %p780_p6, %p779_p5 }
  0x2d   :  { %p782_p8 = pnand %p781_p7, %p775_p4 }
  0x2f   :  { %785 = shalt.err (!%p782_p8)
}
  0x30   :  { %56 = dma.hbm_to_vmem [thread:$0]  %s1086_s4, 256, %s54_s7, [#allocation4]  }
  0x31   :  { %808 = dma.done.wait [#allocation6], 16  }
  0x32   :  { %809 = vsyncadd [#allocation6], 4294967280 }
  0x33   :  { %810 = dma.done.wait [#allocation8], 32  }
  0x34   :  { %811 = vsyncadd [#allocation8], 4294967264 }
  0x35   :  { %812 = dma.done.wait [#allocation4], 256  }
  0x36   :  { %813 = vsyncadd [#allocation4], 4294967040 }
  0x37   :  { %69 = sfence }
  0x38   :  { %s72_s17 = sld [smem:[#allocation3]]  ;;  %v70_v0 = vld [vmem:[#allocation10] sm:$0xff]  ;;  %v71_v1 = vld [vmem:[#allocation10 + $0x8] sm:$0xff]  ;;  %v820_v27 = vmov 683565275   ;;  %s946_s4 = sld [smem:[#allocation7 + $0x9]] }
  0x39   :  { %v821_v29 = vmov 2475754826   ;;  %v822_v31 = vmov 2131351028   ;;  %v823_v33 = vmov 2102212464  }
  0x3a   :  { %v824_v35 = vmov 920167782   ;;  %v825_v43 = vmov 1326507024   ;;  %s948_s18 = sld [smem:[#allocation9 + $0x9]]  ;;  %s950_s19 = sld [smem:[#allocation7 + $0x8]] }
  0x3b   :  { %s952_s20 = sld [smem:[#allocation9 + $0x8]]  ;;  %s955_s21 = sld [smem:[#allocation7 + $0x7]] }
  0x3c   :  { %s957_s22 = sld [smem:[#allocation9 + $0x7]]  ;;  %s973_s23 = sld [smem:[#allocation7 + $0x6]] }
  0x3d   :  { %s975_s24 = sld [smem:[#allocation9 + $0x6]]  ;;  %s991_s25 = sld [smem:[#allocation7 + $0x5]] }
  0x3e   :  { %v73_v2 = vstv %s72_s17  ;;  %s993_s26 = sld [smem:[#allocation9 + $0x5]]  ;;  %s1003_s2 = sld [smem:[#allocation7 + $0x4]] }
  0x3f   :  { %v878_v3 = vmul.f32 %v73_v2, %v70_v0  ;;  %v880_v4 = vmul.f32 %v73_v2, %v71_v1  ;;  %s1005_s0 = sld [smem:[#allocation9 + $0x4]]  ;;  %s1013_s27 = sld [smem:[#allocation7 + $0x3]] }
  0x40   :  { %s1015_s28 = sld [smem:[#allocation9 + $0x3]]  ;;  %s1023_s29 = sld [smem:[#allocation7 + $0x2]] }
  0x41   :  { %v76_v5 = vand.u32 2147483647, %v878_v3  ;;  %v79_v6 = vand.u32 2139095040, %v878_v3  ;;  %v180_v7 = vand.u32 2147483647, %v880_v4  ;;  %v183_v8 = vand.u32 2139095040, %v880_v4 }
  0x42   :  { %vm78_vm14 = vcmp.lt.s32.totalorder %v878_v3, 0  ;;  %s1025_s30 = sld [smem:[#allocation9 + $0x2]]  ;;  %s1033_s6 = sld [smem:[#allocation7 + $0x1]] }
  0x43   :  { %v80_v9 = vshrl.u32 %v79_v6, 23  ;;  %v83_v10 = vand.u32 8388607, %v76_v5  ;;  %v184_v11 = vshrl.u32 %v183_v8, 23  ;;  %v187_v12 = vand.u32 8388607, %v180_v7 }
  0x44   :  { %vm77_vm15 = vcmp.le.f32.partialorder %v76_v5, 0.7853982  ;;  %s1035_s7 = sld [smem:[#allocation9 + $0x1]]  ;;  %s1043_s8 = sld [smem:[#allocation7]] }
  0x45   :  { %v667_v13 = vadd.s32 4294967169, %v80_v9  ;;  %v671_v14 = vadd.s32 4294967169, %v184_v11  ;;  %v84_v16 = vor.u32 8388608, %v83_v10  ;;  %v188_v17 = vor.u32 8388608, %v187_v12  ;;  %s1045_s9 = sld [smem:[#allocation9]]  ;;  %s826_s12 = smov [#allocation11]  }
  0x46   :  { %s656_s3 = sshll.u32 %s826_s12, 4  ;;  %s657_s3 = int_to_ptr.vmem [resolvable:$true] %s656_s3 }
  0x47   :  { %v86_v15 = vadd.s32 1, %v667_v13  ;;  %v190_v18 = vadd.s32 1, %v671_v14  ;;  %v890_v23 = vshll.u32 %v84_v16, 8  ;;  %v892_v25 = vshll.u32 %v188_v17, 8  ;;  %p791_p10 = scmp.lt.s32.totalorder %s657_s3, %s657_s3 }
  0x49   :  { %vm87_vm0 = vcmp.gt.s32.totalorder %v86_v15, 0  ;;  %vm191_vm1 = vcmp.gt.s32.totalorder %v190_v18, 0 }
  0x4a   :  { %v88_v19 = vsel %vm87_vm0, %v86_v15, 0  ;;  %v192_v22 = vsel %vm191_vm1, %v190_v18, 0  ;;  %vm182_vm0 = vcmp.lt.s32.totalorder %v880_v4, 0  ;;  %vm181_vm1 = vcmp.le.f32.partialorder %v180_v7, 0.7853982 }
  0x4b   :  { %v89_v20 = vshrl.u32 %v88_v19, 5  ;;  %v90_v21 = vand.u32 31, %v88_v19  ;;  %v194_v24 = vand.u32 31, %v192_v22  ;;  %v894_v37 = vshrl.u32 %v192_v22, 5 }
  0x4d   :  { %v91_v26 = vsub.s32 32, %v90_v21  ;;  %v93_v28 = vshll.u32 %v820_v27, %v90_v21  ;;  %v96_v30 = vshll.u32 %v821_v29, %v90_v21  ;;  %v99_v32 = vshll.u32 %v822_v31, %v90_v21 }
  0x4e   :  { %v102_v34 = vshll.u32 %v823_v33, %v90_v21  ;;  %v105_v36 = vshll.u32 %v824_v35, %v90_v21  ;;  %vm108_vm2 = vcmp.lt.s32.totalorder %v89_v20, 1  ;;  %vm109_vm3 = vcmp.lt.s32.totalorder %v89_v20, 2 }
  0x4f   :  { %v92_v38 = vshrl.u32 %v820_v27, %v91_v26  ;;  %v94_v39 = vshrl.u32 %v821_v29, %v91_v26  ;;  %v97_v40 = vshrl.u32 %v822_v31, %v91_v26  ;;  %v100_v41 = vshrl.u32 %v823_v33, %v91_v26 }
  0x50   :  { %v103_v42 = vshrl.u32 %v824_v35, %v91_v26  ;;  %v106_v44 = vshrl.u32 %v825_v43, %v91_v26  ;;  %vm111_vm4 = vcmp.lt.s32.totalorder %v89_v20, 4  ;;  %v195_v48 = vsub.s32 32, %v194_v24 }
  0x51   :  { %v95_v45 = vor.u32 %v94_v39, %v93_v28  ;;  %v98_v46 = vor.u32 %v97_v40, %v96_v30  ;;  %v101_v47 = vor.u32 %v100_v41, %v99_v32  ;;  %vm110_vm5 = vcmp.lt.s32.totalorder %v89_v20, 3 }
  0x52   :  { %v104_v49 = vor.u32 %v103_v42, %v102_v34  ;;  %v107_v50 = vor.u32 %v106_v44, %v105_v36  ;;  %v197_v51 = vshll.u32 %v820_v27, %v194_v24  ;;  %v200_v59 = vshll.u32 %v821_v29, %v194_v24 }
  0x53   :  { %v112_v52 = vsel %vm108_vm2, %v92_v38, %v95_v45  ;;  %v113_v53 = vsel %vm111_vm4, %v101_v47, 2102212464  ;;  %v116_v54 = vsel %vm108_vm2, %v95_v45, %v98_v46  ;;  %v120_v55 = vsel %vm108_vm2, %v98_v46, %v101_v47 }
  0x54   :  { %v114_v56 = vsel %vm110_vm5, %v98_v46, %v113_v53  ;;  %v117_v57 = vsel %vm111_vm4, %v104_v49, 920167782  ;;  %v121_v58 = vsel %vm111_vm4, %v107_v50, 1326507024  ;;  %v196_v62 = vshrl.u32 %v820_v27, %v195_v48 }
  0x55   :  { %v118_v60 = vsel %vm110_vm5, %v101_v47, %v117_v57  ;;  %v122_v61 = vsel %vm110_vm5, %v104_v49, %v121_v58  ;;  %v198_v63 = vshrl.u32 %v821_v29, %v195_v48  ;;  %v115_v0 = vsel %vm109_vm3, %v112_v52, %v114_v56 }
  0x56   :  { %v119_v1 = vsel %vm109_vm3, %v116_v54, %v118_v60  ;;  %v123_v2 = vsel %vm109_vm3, %v120_v55, %v122_v61  ;;  %v201_v6 = vshrl.u32 %v822_v31, %v195_v48  ;;  %v203_v14 = vshll.u32 %v822_v31, %v194_v24 }
  0x57   :  { %v903_v8 = vmul.u32.u64.low %v890_v23, %v123_v2  ;;  %v904_v9 = vmul.u32.u64.high %v890_v23, %v123_v2, %v903_v8  ;;  %v907_v10 = vmul.u32.u64.low %v890_v23, %v119_v1  ;;  %v908_v11 = vmul.u32.u64.high %v890_v23, %v119_v1, %v907_v10 }
  0x58   :  { %v199_v12 = vor.u32 %v198_v63, %v197_v51  ;;  %v202_v13 = vor.u32 %v201_v6, %v200_v59  ;;  %v204_v15 = vshrl.u32 %v823_v33, %v195_v48  ;;  %v206_v16 = vshll.u32 %v823_v33, %v194_v24 }
  0x59   :  { %v207_v17 = vshrl.u32 %v824_v35, %v195_v48  ;;  %v209_v18 = vshll.u32 %v824_v35, %v194_v24  ;;  %v210_v19 = vshrl.u32 %v825_v43, %v195_v48  ;;  %v131_v20 = vmul.u32 %v890_v23, %v115_v0 }
  0x5a   :  { %v205_v21 = vor.u32 %v204_v15, %v203_v14  ;;  %vm212_vm6 = vcmp.lt.s32.totalorder %v894_v37, 1  ;;  %vm213_vm7 = vcmp.lt.s32.totalorder %v894_v37, 2  ;;  %vm133_vm8 = vc.u32 %v904_v9, %v907_v10 }
  0x5b   :  { %v134_v22 = vadd.s32 1, %v908_v11  ;;  %v208_v26 = vor.u32 %v207_v17, %v206_v16  ;;  %vm214_vm9 = vcmp.lt.s32.totalorder %v894_v37, 3  ;;  %v211_v27 = vor.u32 %v210_v19, %v209_v18 }
  0x5c   :  { %vm215_vm10 = vcmp.lt.s32.totalorder %v894_v37, 4  ;;  %v216_v28 = vsel %vm212_vm6, %v196_v62, %v199_v12  ;;  %v220_v24 = vsel %vm212_vm6, %v199_v12, %v202_v13  ;;  %v224_v31 = vsel %vm212_vm6, %v202_v13, %v205_v21 }
  0x5d   :  { %v135_v29 = vsel %vm133_vm8, %v134_v22, %v908_v11  ;;  %v217_v23 = vsel %vm215_vm10, %v205_v21, 2102212464  ;;  %v221_v30 = vsel %vm215_vm10, %v208_v26, 920167782  ;;  %v225_v35 = vsel %vm215_vm10, %v211_v27, 1326507024 }
  0x5e   :  { %v136_v32 = vadd.s32 %v135_v29, %v131_v20  ;;  %v218_v33 = vsel %vm214_vm9, %v202_v13, %v217_v23  ;;  %v222_v34 = vsel %vm214_vm9, %v205_v21, %v221_v30  ;;  %v226_v39 = vsel %vm214_vm9, %v208_v26, %v225_v35 }
  0x5f   :  { %v219_v36 = vsel %vm213_vm7, %v216_v28, %v218_v33  ;;  %v223_v38 = vsel %vm213_vm7, %v220_v24, %v222_v34  ;;  %v227_v41 = vsel %vm213_vm7, %v224_v31, %v226_v39  ;;  %v132_v60 = vadd.s32 %v907_v10, %v904_v9 }
  0x60   :  { %v137_v40 = vadd.s32 536870912, %v136_v32  ;;  %v925_v42 = vmul.u32.u64.low %v892_v25, %v223_v38  ;;  %v926_v43 = vmul.u32.u64.high %v892_v25, %v223_v38, %v925_v42  ;;  %v235_v47 = vmul.u32 %v892_v25, %v219_v36 }
  0x61   :  { %v929_v44 = vmul.u32.u64.low %v892_v25, %v227_v41  ;;  %v930_v45 = vmul.u32.u64.high %v892_v25, %v227_v41, %v929_v44  ;;  %vm168_vm8 = vweird.f32 %v878_v3  ;;  %vm272_vm9 = vweird.f32 %v880_v4 }
  0x62   :  { %v138_v46 = vshrl.u32 %v137_v40, 30  ;;  %v238_v49 = vadd.s32 1, %v926_v43 }
  0x63   :  { %vm237_vm11 = vc.u32 %v930_v45, %v925_v42  ;;  %v236_v16 = vadd.s32 %v925_v42, %v930_v45 }
  0x64   :  { %v139_v48 = vshll.u32 %v138_v46, 30  ;;  %v239_v37 = vsel %vm237_vm11, %v238_v49, %v926_v43  ;;  %v162_v21 = vsub.s32 4, %v138_v46 }
  0x65   :  { %v240_v51 = vadd.s32 %v239_v37, %v235_v47 }
  0x66   :  { %v140_v50 = vsub.s32 %v136_v32, %v139_v48  ;;  %v163_v23 = vsel %vm78_vm14, %v162_v21, %v138_v46 }
  0x67   :  { %v241_v53 = vadd.s32 536870912, %v240_v51  ;;  %v165_v33 = vsel %vm77_vm15, 0, %v163_v23  ;;  %v535_v23 = vstv %s975_s24 }
  0x68   :  { %v142_v52 = vsub.s32 0, %v140_v50  ;;  %v169_v35 = vadd.s32 3, %v165_v33  ;;  %v377_v40 = vand.u32 3, %v165_v33 }
  0x69   :  { %v242_v55 = vshrl.u32 %v241_v53, 30 }
  0x6a   :  { %v668_v54 = vmin.u32 %v142_v52, %v140_v50  ;;  %v170_v39 = vand.u32 3, %v169_v35  ;;  %vm382_vm3 = vcmp.eq.s32.totalorder %v377_v40, 2  ;;  %vm379_vm5 = vcmp.eq.s32.totalorder %v377_v40, 0 }
  0x6b   :  { %v243_v57 = vshll.u32 %v242_v55, 30  ;;  %v266_v38 = vsub.s32 4, %v242_v55  ;;  %vm378_vm7 = vcmp.lt.s32.totalorder %v377_v40, 2 }
  0x6c   :  { %v144_v56 = vclz %v668_v54  ;;  %vm175_vm2 = vcmp.eq.s32.totalorder %v170_v39, 2  ;;  %vm172_vm4 = vcmp.eq.s32.totalorder %v170_v39, 0  ;;  %vm171_vm6 = vcmp.lt.s32.totalorder %v170_v39, 2 }
  0x6d   :  { %v244_v59 = vsub.s32 %v240_v51, %v243_v57  ;;  %v267_v42 = vsel %vm182_vm0, %v266_v38, %v242_v55 }
  0x6e   :  { %v669_v58 = vadd.s32 4294967294, %v144_v56  ;;  %v269_v45 = vsel %vm181_vm1, 0, %v267_v42  ;;  %v543_v42 = vstv %s991_s25 }
  0x6f   :  { %v246_v61 = vsub.s32 0, %v244_v59  ;;  %v273_v47 = vadd.s32 3, %v269_v45  ;;  %v480_v55 = vand.u32 3, %v269_v45 }
  0x70   :  { %vm670_vm12 = vcmp.lt.s32.totalorder %v669_v58, 0 }
  0x71   :  { %v147_v25 = vsel %vm670_vm12, 0, %v669_v58  ;;  %v672_v1 = vmin.u32 %v246_v61, %v244_v59  ;;  %v274_v53 = vand.u32 3, %v273_v47  ;;  %v493_v58 = vstv %s946_s4 }
  0x72   :  { %v148_v62 = vsub.s32 32, %v147_v25  ;;  %v149_v63 = vshll.u32 %v140_v50, %v147_v25  ;;  %v152_v0 = vsub.s32 4294967266, %v147_v25  ;;  %v505_v25 = vstv %s952_s20 }
  0x73   :  { %v248_v8 = vclz %v672_v1  ;;  %vm279_vm10 = vcmp.eq.s32.totalorder %v274_v53, 2  ;;  %vm485_vm11 = vcmp.eq.s32.totalorder %v480_v55, 2  ;;  %vm276_vm12 = vcmp.eq.s32.totalorder %v274_v53, 0 }
  0x74   :  { %v150_v2 = vshrl.u32 %v132_v60, %v148_v62  ;;  %v153_v6 = vadd.s32 127, %v152_v0  ;;  %v499_v60 = vstv %s950_s19 }
  0x75   :  { %v673_v13 = vadd.s32 4294967294, %v248_v8 }
  0x76   :  { %v151_v11 = vor.u32 %v150_v2, %v149_v63  ;;  %v154_v12 = vshll.u32 %v153_v6, 23 }
  0x77   :  { %vm674_vm13 = vcmp.lt.s32.totalorder %v673_v13, 0 }
  0x78   :  { %v155_v14 = vor.u32 4788187, %v154_v12  ;;  %v158_v15 = vcvt.s32.f32 %v151_v11  ;;  %v251_v9 = vsel %vm674_vm13, 0, %v673_v13  ;;  %vm481_vm13 = vcmp.lt.s32.totalorder %v480_v55, 2 }
  0x79   :  { %v252_v10 = vsub.s32 32, %v251_v9  ;;  %v253_v18 = vshll.u32 %v244_v59, %v251_v9  ;;  %v256_v19 = vsub.s32 4294967266, %v251_v9  ;;  %v511_v13 = vstv %s955_s21 }
  0x7a   :  { %v156_v17 = vand.u32 2147483647, %v155_v14  ;;  %v519_v14 = vstv %s957_s22 }
  0x7b   :  { %v254_v22 = vshrl.u32 %v236_v16, %v252_v10  ;;  %v257_v26 = vadd.s32 127, %v256_v19 }
  0x7c   :  { %v159_v20 = vmul.f32 %v158_v15, %v156_v17 }
  0x7d   :  { %v255_v28 = vor.u32 %v254_v22, %v253_v18  ;;  %v258_v24 = vshll.u32 %v257_v26, 23 }
  0x7e   :  { %v160_v27 = vxor.u32 2147483648, %v159_v20 }
  0x7f   :  { %v259_v31 = vor.u32 4788187, %v258_v24  ;;  %v262_v32 = vcvt.s32.f32 %v255_v28 }
  0x80   :  { %v161_v29 = vsel %vm78_vm14, %v160_v27, %v159_v20  ;;  %vm482_vm14 = vcmp.eq.s32.totalorder %v480_v55, 0  ;;  %v567_v55 = vstv %s1005_s0 }
  0x81   :  { %v164_v30 = vsel %vm77_vm15, %v878_v3, %v161_v29  ;;  %v260_v34 = vand.u32 2147483647, %v259_v31  ;;  %v495_v3 = vstv %s948_s18  ;;  %vm275_vm15 = vcmp.lt.s32.totalorder %v274_v53, 2 }
  0x82   :  { %720 = vcosq.f32 %v164_v30  ;;  %v527_v29 = vstv %s973_s23 }
  0x83   :  { %722 = vsinq.f32 %v164_v30  ;;  %v263_v36 = vmul.f32 %v262_v32, %v260_v34 }
  0x85   :  { %v264_v5 = vxor.u32 2147483648, %v263_v36 }
  0x87   :  { %v265_v41 = vsel %vm182_vm0, %v264_v5, %v263_v36 }
  0x88   :  { %v268_v43 = vsel %vm181_vm1, %v880_v4, %v265_v41 }
  0x89   :  { %724 = vcosq.f32 %v268_v43 }
  0x8a   :  { %726 = vsinq.f32 %v268_v43  ;;  %v551_v43 = vstv %s993_s26 }
  0x8c   :  { %v721_v44 = vpop.eup %720 }
  0x8d   :  { %v723_v7 = vpop.eup %722  ;;  %v176_v46 = vxor.u32 2147483648, %v721_v44 }
  0x8e   :  { %v173_v48 = vxor.u32 2147483648, %v723_v7 }
  0x8f   :  { %v177_v49 = vsel %vm175_vm2, %v176_v46, %v723_v7  ;;  %v384_v50 = vsel %vm382_vm3, %v176_v46, %v723_v7 }
  0x90   :  { %v174_v37 = vsel %vm172_vm4, %v721_v44, %v173_v48  ;;  %v381_v51 = vsel %vm379_vm5, %v721_v44, %v173_v48 }
  0x91   :  { %v178_v52 = vsel %vm171_vm6, %v174_v37, %v177_v49  ;;  %v385_v54 = vsel %vm378_vm7, %v381_v51, %v384_v50 }
  0x92   :  { %v959_v56 = vsel %vm168_vm8, nan, %v178_v52  ;;  %v961_v57 = vsel %vm168_vm8, nan, %v385_v54  ;;  %v559_v54 = vstv %s1003_s2 }
  0x93   :  { %v966_v59 = vmul.f32 2.0, %v961_v57  ;;  %v725_v61 = vpop.eup %724 }
  0x94   :  { %v727_v0 = vpop.eup %726  ;;  %v280_v1 = vxor.u32 2147483648, %v725_v61 }
  0x95   :  { %v497_v62 = vmul.f32 %v493_v58, %v966_v59  ;;  %v503_v63 = vmul.f32 %v495_v3, %v966_v59  ;;  %v277_v2 = vxor.u32 2147483648, %v727_v0 }
  0x96   :  { %v281_v11 = vsel %vm279_vm10, %v280_v1, %v727_v0  ;;  %v487_v12 = vsel %vm485_vm11, %v280_v1, %v727_v0 }
  0x97   :  { %v500_v6 = vadd.f32 %v499_v60, %v497_v62  ;;  %v506_v8 = vadd.f32 %v505_v25, %v503_v63  ;;  %v278_v15 = vsel %vm276_vm12, %v725_v61, %v277_v2  ;;  %v484_v16 = vsel %vm482_vm14, %v725_v61, %v277_v2 }
  0x98   :  { %v981_v10 = vsel %vm275_vm15, %v278_v15, %v281_v11  ;;  %v488_v18 = vsel %vm481_vm13, %v484_v16, %v487_v12  ;;  %v575_v11 = vstv %s1013_s27  ;;  %v583_v12 = vstv %s1015_s28 }
  0x99   :  { %v509_v17 = vmul.f32 %v500_v6, %v966_v59  ;;  %v517_v9 = vmul.f32 %v506_v8, %v966_v59  ;;  %v986_v19 = vsel %vm272_vm9, nan, %v488_v18 }
  0x9a   :  { %v989_v22 = vmul.f32 2.0, %v986_v19 }
  0x9b   :  { %v512_v20 = vadd.f32 %v511_v13, %v509_v17  ;;  %v520_v21 = vadd.f32 %v519_v14, %v517_v9 }
  0x9c   :  { %v498_v28 = vmul.f32 %v493_v58, %v989_v22  ;;  %v504_v24 = vmul.f32 %v495_v3, %v989_v22 }
  0x9d   :  { %v514_v26 = vsub.f32 %v512_v20, %v493_v58  ;;  %v522_v27 = vsub.f32 %v520_v21, %v495_v3 }
  0x9e   :  { %v501_v32 = vadd.f32 %v499_v60, %v498_v28  ;;  %v507_v33 = vadd.f32 %v505_v25, %v504_v24  ;;  %v591_v24 = vstv %s1023_s29 }
  0x9f   :  { %v525_v30 = vmul.f32 %v514_v26, %v966_v59  ;;  %v533_v31 = vmul.f32 %v522_v27, %v966_v59 }
  0xa0   :  { %v510_v36 = vmul.f32 %v501_v32, %v989_v22  ;;  %v518_v38 = vmul.f32 %v507_v33, %v989_v22 }
  0xa1   :  { %v528_v34 = vadd.f32 %v527_v29, %v525_v30  ;;  %v536_v35 = vadd.f32 %v535_v23, %v533_v31 }
  0xa2   :  { %v513_v40 = vadd.f32 %v511_v13, %v510_v36  ;;  %v521_v41 = vadd.f32 %v519_v14, %v518_v38 }
  0xa3   :  { %v530_v5 = vsub.f32 %v528_v34, %v500_v6  ;;  %v538_v39 = vsub.f32 %v536_v35, %v506_v8 }
  0xa4   :  { %v515_v7 = vsub.f32 %v513_v40, %v493_v58  ;;  %v523_v46 = vsub.f32 %v521_v41, %v495_v3  ;;  %v607_v41 = vstv %s1033_s6 }
  0xa5   :  { %v541_v44 = vmul.f32 %v530_v5, %v966_v59  ;;  %v549_v45 = vmul.f32 %v538_v39, %v966_v59 }
  0xa6   :  { %v526_v49 = vmul.f32 %v515_v7, %v989_v22  ;;  %v534_v50 = vmul.f32 %v523_v46, %v989_v22 }
  0xa7   :  { %v544_v47 = vadd.f32 %v543_v42, %v541_v44  ;;  %v552_v48 = vadd.f32 %v551_v43, %v549_v45 }
  0xa8   :  { %v529_v52 = vadd.f32 %v527_v29, %v526_v49  ;;  %v537_v53 = vadd.f32 %v535_v23, %v534_v50  ;;  %v599_v29 = vstv %s1025_s30 }
  0xa9   :  { %v546_v37 = vsub.f32 %v544_v47, %v514_v26  ;;  %v554_v51 = vsub.f32 %v552_v48, %v522_v27 }
  0xaa   :  { %v531_v60 = vsub.f32 %v529_v52, %v501_v32  ;;  %v539_v25 = vsub.f32 %v537_v53, %v507_v33  ;;  %v623_v53 = vstv %s1043_s8 }
  0xab   :  { %v557_v58 = vmul.f32 %v546_v37, %v966_v59  ;;  %v565_v3 = vmul.f32 %v554_v51, %v966_v59 }
  0xac   :  { %v542_v63 = vmul.f32 %v531_v60, %v989_v22  ;;  %v550_v0 = vmul.f32 %v539_v25, %v989_v22 }
  0xad   :  { %v560_v61 = vadd.f32 %v559_v54, %v557_v58  ;;  %v568_v62 = vadd.f32 %v567_v55, %v565_v3 }
  0xae   :  { %v545_v6 = vadd.f32 %v543_v42, %v542_v63  ;;  %v553_v8 = vadd.f32 %v551_v43, %v550_v0  ;;  %v615_v42 = vstv %s1035_s7 }
  0xaf   :  { %v562_v1 = vsub.f32 %v560_v61, %v530_v5  ;;  %v570_v2 = vsub.f32 %v568_v62, %v538_v39 }
  0xb0   :  { %v547_v15 = vsub.f32 %v545_v6, %v515_v7  ;;  %v555_v16 = vsub.f32 %v553_v8, %v523_v46 }
  0xb1   :  { %v573_v13 = vmul.f32 %v562_v1, %v966_v59  ;;  %v581_v14 = vmul.f32 %v570_v2, %v966_v59 }
  0xb2   :  { %v558_v18 = vmul.f32 %v547_v15, %v989_v22  ;;  %v566_v20 = vmul.f32 %v555_v16, %v989_v22 }
  0xb3   :  { %v576_v17 = vadd.f32 %v575_v11, %v573_v13  ;;  %v584_v9 = vadd.f32 %v583_v12, %v581_v14 }
  0xb4   :  { %v561_v27 = vadd.f32 %v559_v54, %v558_v18  ;;  %v569_v28 = vadd.f32 %v567_v55, %v566_v20  ;;  %v631_v54 = vstv %s1045_s9 }
  0xb5   :  { %v578_v21 = vsub.f32 %v576_v17, %v546_v37  ;;  %v586_v26 = vsub.f32 %v584_v9, %v554_v51 }
  0xb6   :  { %v563_v31 = vsub.f32 %v561_v27, %v531_v60  ;;  %v571_v32 = vsub.f32 %v569_v28, %v539_v25 }
  0xb7   :  { %v589_v23 = vmul.f32 %v578_v21, %v966_v59  ;;  %v597_v30 = vmul.f32 %v586_v26, %v966_v59 }
  0xb8   :  { %v574_v35 = vmul.f32 %v563_v31, %v989_v22  ;;  %v582_v36 = vmul.f32 %v571_v32, %v989_v22 }
  0xb9   :  { %v592_v33 = vadd.f32 %v591_v24, %v589_v23  ;;  %v600_v34 = vadd.f32 %v599_v29, %v597_v30 }
  0xba   :  { %v577_v39 = vadd.f32 %v575_v11, %v574_v35  ;;  %v585_v40 = vadd.f32 %v583_v12, %v582_v36 }
  0xbb   :  { %v594_v38 = vsub.f32 %v592_v33, %v562_v1  ;;  %v602_v5 = vsub.f32 %v600_v34, %v570_v2 }
  0xbc   :  { %v579_v45 = vsub.f32 %v577_v39, %v547_v15  ;;  %v587_v7 = vsub.f32 %v585_v40, %v555_v16  ;;  %v645_v16 = vstv %s1083_s1  ;;  %s786_s1 = scalar_lea.vmem %s657_s3, 256 }
  0xbd   :  { %v605_v43 = vmul.f32 %v594_v38, %v966_v59  ;;  %v613_v44 = vmul.f32 %v602_v5, %v966_v59  ;;  %p787_p9 = scmp.ne.s32.totalorder %s657_s3, %s786_s1  ;;  %p792_p11 = scmp.lt.s32.totalorder %s786_s1, %s786_s1 }
  0xbe   :  { %v590_v48 = vmul.f32 %v579_v45, %v989_v22  ;;  %v598_v49 = vmul.f32 %v587_v7, %v989_v22 }
  0xbf   :  { %v608_v46 = vadd.f32 %v607_v41, %v605_v43  ;;  %v616_v47 = vadd.f32 %v615_v42, %v613_v44  ;;  %p793_p12 = por %p792_p11, %p791_p10 }
  0xc0   :  { %v593_v51 = vadd.f32 %v591_v24, %v590_v48  ;;  %v601_v52 = vadd.f32 %v599_v29, %v598_v49 }
  0xc1   :  { %v610_v50 = vsub.f32 %v608_v46, %v578_v21  ;;  %v618_v37 = vsub.f32 %v616_v47, %v586_v26  ;;  %p794_p13 = pnand %p793_p12, %p787_p9 }
  0xc2   :  { %v595_v3 = vsub.f32 %v593_v51, %v563_v31  ;;  %v603_v60 = vsub.f32 %v601_v52, %v571_v32 }
  0xc3   :  { %v621_v55 = vmul.f32 %v610_v50, %v966_v59  ;;  %v629_v58 = vmul.f32 %v618_v37, %v966_v59 }
  0xc4   :  { %v606_v62 = vmul.f32 %v595_v3, %v989_v22  ;;  %v614_v63 = vmul.f32 %v603_v60, %v989_v22 }
  0xc5   :  { %v624_v25 = vadd.f32 %v623_v53, %v621_v55  ;;  %v632_v61 = vadd.f32 %v631_v54, %v629_v58 }
  0xc6   :  { %v609_v2 = vadd.f32 %v607_v41, %v606_v62  ;;  %v617_v6 = vadd.f32 %v615_v42, %v614_v63 }
  0xc7   :  { %v626_v0 = vsub.f32 %v624_v25, %v594_v38  ;;  %v634_v1 = vsub.f32 %v632_v61, %v602_v5 }
  0xc8   :  { %v611_v12 = vsub.f32 %v609_v2, %v579_v45  ;;  %v619_v13 = vsub.f32 %v617_v6, %v587_v7 }
  0xc9   :  { %v636_v8 = vmul.f32 %v626_v0, %v959_v56  ;;  %v638_v11 = vmul.f32 %v634_v1, %v961_v57  ;;  %v283_v56 = vsel %vm272_vm9, nan, %v981_v10 }
  0xca   :  { %v622_v59 = vmul.f32 %v611_v12, %v989_v22  ;;  %v630_v15 = vmul.f32 %v619_v13, %v989_v22 }
  0xcb   :  { %v640_v14 = vadd.f32 %v638_v11, %v636_v8 }
  0xcc   :  { %v625_v9 = vadd.f32 %v623_v53, %v622_v59  ;;  %v633_v18 = vadd.f32 %v631_v54, %v630_v15 }
  0xcd   :  { %v642_v17 = vsub.f32 %v640_v14, %v618_v37 }
  0xce   :  { %v627_v57 = vsub.f32 %v625_v9, %v595_v3  ;;  %v635_v21 = vsub.f32 %v633_v18, %v603_v60 }
  0xcf   :  { %v646_v20 = vadd.f32 %v645_v16, %v642_v17 }
  0xd0   :  { %v637_v26 = vmul.f32 %v627_v57, %v283_v56  ;;  %v639_v27 = vmul.f32 %v635_v21, %v986_v19 }
  0xd1   :  { %648 = vst [vmem:[#allocation11] sm:$0xff] %v646_v20 }
  0xd2   :  { %v641_v28 = vadd.f32 %v639_v27, %v637_v26 }
  0xd4   :  { %v643_v22 = vsub.f32 %v641_v28, %v619_v13 }
  0xd6   :  { %v647_v24 = vadd.f32 %v645_v16, %v643_v22 }
  0xd8   :  { %649 = vst [vmem:[#allocation11 + $0x8] sm:$0xff] %v647_v24 }
  0xd9   :  { %797 = shalt.err (!%p794_p13)
}
  0xda   :  { %s798_s15 = scalar_lea.hbm %s1087_s5, 256 }
  0xdb   :  { %p799_p0 = scmp.ne.s32.totalorder %s1087_s5, %s798_s15  ;;  %p802_p1 = scmp.lt.u32.totalorder %s798_s15, %s1087_s5 }
  0xdd   :  { %p804_p2 = pnand %p802_p1, %p799_p0 }
  0xdf   :  { %807 = shalt.err (!%p804_p2)
}
  0xe0   :  { %659 = dma.vmem_to_hbm [thread:$0]  %s657_s3, 256, %s1087_s5, [#allocation5]  }
  0xe1   :  { %814 = dma.done.wait [#allocation5], 256  }
  0xe2   :  { %815 = vsyncadd [#allocation5], 4294967040 }
  0xe3   :  { %663 = vsyncpa [#allocation4], 1 }
  0xe4   :  { %664 = vsyncpa [#allocation5], 1 }
  0xe5   :  { %665 = vsyncpa [#allocation6], 1 }
  0xe6   :  { %666 = vsyncpa [#allocation8], 1 }

</bundles_post_ra>
